<compile_context>
chip_gen: v5e
topology: v5e:2x2
jax: 0.10.0
libtpu: 0.0.40
codegen_flags: <defaults>
</compile_context>

<pallas_src>
import jax
import jax.numpy as jnp
from jax.experimental import pallas as pl
from jax.experimental.pallas import tpu as pltpu


_LANE = 128
_TARGET_BLOCK_BYTES = 2 * 1024 * 1024  # ~2 MiB per block (roofline plateau)


def _identity_copy_kernel(x_ref, o_ref):
    # Pure identity: copy the current VMEM tile to the (aliased) output tile.
    o_ref[...] = x_ref[...]


def _round_up(a, b):
    return ((a + b - 1) // b) * b


def _round_down(a, b):
    return (a // b) * b


def _choose_layout(n, itemsize):
    """Pick a lane-dense (rows, cols) view and row-block size for n elements.

    Returns (cols, rows, block_rows, pad_elems).
    """
    # Native sublane tile: 8 for f32, 16 for bf16, 32 for int8.
    sub = max(8, 32 // max(1, itemsize))

    # Prefer cols that is a large multiple of 128 AND leaves rows a multiple
    # of the sublane tile (fully dense vregs in both minor dims).
    cols = None
    for c in (2048, 1024, 512, 256, 128):
        if n % c == 0 and (n // c) % sub == 0:
            cols = c
            break
    if cols is None:
        # Relax: only require a lane-dense last dim.
        for c in (2048, 1024, 512, 256, 128):
            if n % c == 0:
                cols = c
                break
    pad = 0
    if cols is None:
        # n is not a multiple of 128: pad the flat array in the wrapper so the
        # kernel still sees a fully lane-dense slab (unmasked vld/vst).
        cols = _LANE
        pad = _round_up(n, cols) - n

    rows = (n + pad) // cols

    # Size the row block by bytes: ~2 MiB per block. With double-buffered
    # input + output (4 block copies) this stays well under the scoped VMEM
    # limit on every generation, including v7x's 32 MiB default.
    block_rows = _TARGET_BLOCK_BYTES // (cols * itemsize)
    block_rows = max(sub, _round_down(block_rows, sub))
    if rows <= block_rows:
        # Full-extent row block: always legal regardless of divisibility.
        block_rows = rows
    # else: block_rows is a multiple of the sublane tile; any ragged final
    # block is handled by the pl.cdiv grid (OOB output rows are masked).
    return cols, rows, block_rows, pad


def print_forward(x):
    """Reproduces Print.forward: prints the shape, returns x unchanged."""
    # Host-side print of the static shape (equivalent to PyTorch's
    # `print(x.shape)`; under jax.jit this prints once per trace, which
    # matches the static-shape semantics).
    print(tuple(x.shape))

    if x.size == 0:
        return x

    orig_shape = x.shape
    dtype = x.dtype
    itemsize = x.dtype.itemsize
    n = x.size

    cols, rows, block_rows, pad = _choose_layout(n, itemsize)

    flat = x.reshape(-1)
    if pad:
        flat = jnp.concatenate([flat, jnp.zeros((pad,), dtype=dtype)])
    x2 = flat.reshape(rows, cols)

    grid = (pl.cdiv(rows, block_rows),)

    out = pl.pallas_call(
        _identity_copy_kernel,
        out_shape=jax.ShapeDtypeStruct((rows, cols), dtype),
        grid=grid,
        in_specs=[pl.BlockSpec((block_rows, cols), lambda i: (i, 0))],
        out_specs=pl.BlockSpec((block_rows, cols), lambda i: (i, 0)),
        # Alias output onto the input buffer: no second HBM allocation; the
        # copy is in-place when the input can be donated.
        input_output_aliases={0: 0},
        compiler_params=pltpu.CompilerParams(
            # "parallel" lets v7x's two TensorCores split the row grid.
            dimension_semantics=("parallel",),
        ),
        cost_estimate=pl.CostEstimate(
            flops=0,
            transcendentals=0,
            bytes_accessed=int(2 * rows * cols * itemsize),
        ),
    )(x2)

    out_flat = out.reshape(-1)
    if pad:
        out_flat = out_flat[:n]
    return out_flat.reshape(orig_shape)


if __name__ == "__main__":
    key = jax.random.PRNGKey(0)
    # Small NCHW input consistent with a conv-net util layer.
    x = jax.random.normal(key, (2, 4, 16, 16), dtype=jnp.float32)

    y = print_forward(x)
    y = jax.block_until_ready(y)

    assert y.shape == x.shape
    assert y.dtype == x.dtype
    assert bool(jnp.all(y == x))

    print("KERNEL_OK")
</pallas_src>

<mosaic_0001>
module attributes {stable_mosaic.version = 11 : i64} {
  func.func @_identity_copy_kernel(%arg0: i32, %arg1: memref<8x256xf32, #tpu.memory_space<vmem>>, %arg2: memref<8x256xf32, #tpu.memory_space<vmem>>) attributes {dimension_semantics = [#tpu.dimension_semantics<parallel>], iteration_bounds = array<i64: 1>, scalar_prefetch = 0 : i64, scratch_operands = 0 : i64, tpu.core_type = #tpu.core_type<tc>, window_params = [{transform_indices = @transform_0, window_bounds = array<i64: 8, 256>}, {transform_indices = @transform_1, window_bounds = array<i64: 8, 256>}]} {
    %c0 = arith.constant 0 : index
    %c0_0 = arith.constant 0 : index
    %0 = vector.load %arg1[%c0, %c0_0] : memref<8x256xf32, #tpu.memory_space<vmem>>, vector<8x256xf32>
    %c0_1 = arith.constant 0 : index
    %c0_2 = arith.constant 0 : index
    %1 = vector.load %arg2[%c0_1, %c0_2] : memref<8x256xf32, #tpu.memory_space<vmem>>, vector<8x256xf32>
    tpu.vector_store %arg2[%c0_1, %c0_2], %0 {strides = array<i32>} : memref<8x256xf32, #tpu.memory_space<vmem>>, vector<8x256xf32>,
    return
  }
  func.func @transform_0(%arg0: i32) -> (i32, i32) {
    %c0_i32 = arith.constant 0 : i32
    %c0_i32_0 = arith.constant 0 : i32
    return %arg0, %c0_i32 : i32, i32
  }
  func.func @transform_1(%arg0: i32) -> (i32, i32) {
    %c0_i32 = arith.constant 0 : i32
    %c0_i32_0 = arith.constant 0 : i32
    return %arg0, %c0_i32 : i32, i32
  }
}

</mosaic_0001>

<bundles_post_ra>
// kernel: tpu_custom_call.1
= control target key start
LH: loop header
LB: loop body
LE: loop exit
PB: predicated region body
PF: predicated region fallthrough
CT: control target
= control target key end

     0   :  { %6 = vsyncpa [#allocation3], 0  ;;  %s116_s0 = inlined_call_operand.hbm [shape: f32[8,256], index: 0, kind: input, shape index: {}, may-alias: {0,1}]   ;;  %s117_s1 = inlined_call_operand.hbm [shape: f32[8,256], index: 1, kind: output, shape index: {}, may-alias: {0,1}]  }
   0x1   :  { %7 = vsyncpa [#allocation4], 0  ;;  %s13_s8 = sshll.u32 %s116_s0, 4  ;;  %s98_s9 = smov [#allocation2]   ;;  %s14_s8 = int_to_ptr.hbm [resolvable:$true] %s13_s8 }
   0x2   :  { %s15_s10 = sshll.u32 %s98_s9, 4  ;;  %s16_s10 = int_to_ptr.vmem [resolvable:$true] %s15_s10 }
   0x3   :  { %18 = dma.hbm_to_vmem [thread:$0]  %s14_s8, 256, %s16_s10, [#allocation3]  }
   0x4   :  { %94 = dma.done.wait [#allocation3], 256  }
   0x5   :  { %95 = vsyncadd [#allocation3], 4294967040  ;;  %s99_s11 = smov [#allocation5]   ;;  %s34_s15 = sshll.u32 %s117_s1, 4  ;;  %v23_v0 = vld [vmem:[#allocation2] sm:$0xff]  ;;  %v24_v1 = vld [vmem:[#allocation2 + $0x8] sm:$0xff]  ;;  %s35_s15 = int_to_ptr.hbm [resolvable:$true] %s34_s15 }
   0x6   :  { %s32_s12 = sshll.u32 %s99_s11, 4  ;;  %25 = vst [vmem:[#allocation5] sm:$0xff] %v23_v0  ;;  %s33_s12 = int_to_ptr.vmem [resolvable:$true] %s32_s12 }
   0x7   :  { %26 = vst [vmem:[#allocation5 + $0x8] sm:$0xff] %v24_v1 }
   0x8   :  { %37 = dma.vmem_to_hbm [thread:$0]  %s33_s12, 256, %s35_s15, [#allocation4]  }
   0x9   :  { %96 = dma.done.wait [#allocation4], 256  }
   0xa   :  { %97 = vsyncadd [#allocation4], 4294967040 }
   0xb   :  { %42 = vsyncpa [#allocation3], 1 }
   0xc   :  { %43 = vsyncpa [#allocation4], 1 }

</bundles_post_ra>
